<compile_context>
chip_gen: v6e
topology: v6e:2x2x1
jax: 0.10.0
libtpu: 0.0.40
codegen_flags: <defaults>
</compile_context>

<pallas_src>
import jax
import jax.numpy as jnp
from jax.experimental import pallas as pl
from jax.experimental.pallas import tpu as pltpu

TILE_B = 256       # batch rows per grid step (fills MXU rows on v6e/v7x, fine on v5e)
PAD = 128          # lane-padded width; all layer dims (13/64/32/16/3) fit in one vreg lane span
NEG_SLOPE = 0.01   # PyTorch nn.LeakyReLU default negative_slope


def mlp_kernel(x_ref, w_ref, b_ref, o_ref):
    # x_ref: (TILE_B, PAD)    bf16  zero-padded input features
    # w_ref: (4, PAD, PAD)    bf16  zero-padded weights, one 128x128 slab per layer
    # b_ref: (4, 1, PAD)      f32   zero-padded biases
    # o_ref: (TILE_B, PAD)    f32   lane-dense output (real logits live in cols [:out_dim])
    h = jnp.dot(x_ref[...], w_ref[0], preferred_element_type=jnp.float32) + b_ref[0]
    h = jnp.where(h >= 0.0, h, NEG_SLOPE * h).astype(jnp.bfloat16)        # LeakyReLU

    h = jnp.dot(h, w_ref[1], preferred_element_type=jnp.float32) + b_ref[1]
    h = jnp.maximum(h, 0.0).astype(jnp.bfloat16)                          # ReLU

    h = jnp.dot(h, w_ref[2], preferred_element_type=jnp.float32) + b_ref[2]
    h = jnp.maximum(h, 0.0).astype(jnp.bfloat16)                          # ReLU

    h = jnp.dot(h, w_ref[3], preferred_element_type=jnp.float32) + b_ref[3]
    o_ref[...] = h.astype(o_ref.dtype)                                    # no final activation


def pack_params(params):
    """Pack the 4 (W, b) pairs into two lane-padded slabs (one DMA each)."""
    ws, bs = [], []
    for w, b in zip(params[0::2], params[1::2]):
        wp = jnp.zeros((PAD, PAD), jnp.float32).at[: w.shape[0], : w.shape[1]].set(w)
        bp = jnp.zeros((1, PAD), jnp.float32).at[:, : b.shape[-1]].set(b.reshape(1, -1))
        ws.append(wp)
        bs.append(bp)
    w_slab = jnp.stack(ws).astype(jnp.bfloat16)   # (4, 128, 128) bf16 ~= 128 KiB
    b_slab = jnp.stack(bs)                        # (4, 1, 128)  f32
    return w_slab, b_slab


@jax.jit
def mlp_forward(x, params):
    B, in_dim = x.shape
    out_dim = params[-2].shape[1]
    w_slab, b_slab = pack_params(params)

    # Pad batch to a multiple of TILE_B and features to the 128-lane width.
    b_pad = ((B + TILE_B - 1) // TILE_B) * TILE_B
    x_pad = jnp.zeros((b_pad, PAD), jnp.bfloat16).at[:B, :in_dim].set(
        x.astype(jnp.bfloat16))

    out = pl.pallas_call(
        mlp_kernel,
        out_shape=jax.ShapeDtypeStruct((b_pad, PAD), jnp.float32),
        grid=(b_pad // TILE_B,),
        in_specs=[
            pl.BlockSpec((TILE_B, PAD), lambda i: (i, 0)),      # x: streamed per batch tile
            pl.BlockSpec((4, PAD, PAD), lambda i: (0, 0, 0)),   # weights: VMEM-resident
            pl.BlockSpec((4, 1, PAD), lambda i: (0, 0, 0)),     # biases: VMEM-resident
        ],
        out_specs=pl.BlockSpec((TILE_B, PAD), lambda i: (i, 0)),  # lane-dense output
        compiler_params=pltpu.CompilerParams(
            dimension_semantics=("parallel",)),                   # shard batch across TCs (v7x)
    )(x_pad, w_slab, b_slab)

    return out[:B, :out_dim]


def init_linear(key, fan_in, fan_out):
    # Mimic PyTorch default nn.Linear init: U(-1/sqrt(fan_in), 1/sqrt(fan_in)).
    kw, kb = jax.random.split(key)
    bound = 1.0 / (fan_in ** 0.5)
    w = jax.random.uniform(kw, (fan_in, fan_out), jnp.float32, -bound, bound)
    b = jax.random.uniform(kb, (1, fan_out), jnp.float32, -bound, bound)
    return w, b


def ref_forward(x, params):
    # Pure-JAX reference with the same bf16-operand / f32-accumulate flow as the kernel.
    (w1, b1, w2, b2, w3, b3, w4, b4) = params

    def lin(h, w, b):
        return jnp.dot(h.astype(jnp.bfloat16), w.astype(jnp.bfloat16),
                       preferred_element_type=jnp.float32) + b

    h = lin(x, w1, b1)
    h = jnp.where(h >= 0.0, h, NEG_SLOPE * h)
    h = jnp.maximum(lin(h, w2, b2), 0.0)
    h = jnp.maximum(lin(h, w3, b3), 0.0)
    return lin(h, w4, b4)


if __name__ == "__main__":
    # Wine dataset geometry: 13 input features, 3 classes.
    input_dim, output_dim = 13, 3
    batch = 512  # two 256-row grid tiles

    key = jax.random.PRNGKey(0)
    kx, k1, k2, k3, k4 = jax.random.split(key, 5)

    x = jax.random.normal(kx, (batch, input_dim), jnp.float32)
    w1, b1 = init_linear(k1, input_dim, 64)
    w2, b2 = init_linear(k2, 64, 32)
    w3, b3 = init_linear(k3, 32, 16)
    w4, b4 = init_linear(k4, 16, output_dim)
    params = (w1, b1, w2, b2, w3, b3, w4, b4)

    out = mlp_forward(x, params)
    jax.block_until_ready(out)

    ref = ref_forward(x, params)
    assert out.shape == (batch, output_dim)
    assert jnp.allclose(out, ref, atol=1e-3, rtol=1e-3), (
        float(jnp.max(jnp.abs(out - ref))))

    print("KERNEL_OK")
</pallas_src>

<mosaic_0001>
module attributes {stable_mosaic.version = 11 : i64} {
  func.func @mlp_kernel(%arg0: i32, %arg1: memref<256x128xbf16, #tpu.memory_space<vmem>>, %arg2: memref<4x128x128xbf16, #tpu.memory_space<vmem>>, %arg3: memref<4x1x128xf32, #tpu.memory_space<vmem>>, %arg4: memref<256x128xf32, #tpu.memory_space<vmem>>) attributes {dimension_semantics = [#tpu.dimension_semantics<parallel>], iteration_bounds = array<i64: 2>, scalar_prefetch = 0 : i64, scratch_operands = 0 : i64, tpu.core_type = #tpu.core_type<tc>, window_params = [{transform_indices = @transform_0, window_bounds = array<i64: 256, 128>}, {pipeline_mode = #tpu.pipeline_mode<synchronous>, transform_indices = @transform_1, window_bounds = array<i64: 4, 128, 128>}, {pipeline_mode = #tpu.pipeline_mode<synchronous>, transform_indices = @transform_2, window_bounds = array<i64: 4, 1, 128>}, {transform_indices = @transform_3, window_bounds = array<i64: 256, 128>}]} {
    %c0 = arith.constant 0 : index
    %c0_0 = arith.constant 0 : index
    %0 = vector.load %arg1[%c0, %c0_0] : memref<256x128xbf16, #tpu.memory_space<vmem>>, vector<256x128xbf16>
    %c0_1 = arith.constant 0 : index
    %c0_2 = arith.constant 0 : index
    %c0_3 = arith.constant 0 : index
    %1 = vector.load %arg2[%c0_1, %c0_2, %c0_3] : memref<4x128x128xbf16, #tpu.memory_space<vmem>>, vector<1x128x128xbf16>
    %2 = vector.shape_cast %1 : vector<1x128x128xbf16> to vector<128x128xbf16>
    %cst = arith.constant dense<0.000000e+00> : vector<256x128xf32>
    %3 = tpu.matmul %0, %2, %cst {dimension_numbers = #tpu.dot_dimension_numbers<[1], [0], [0], [1], [0, 0, 1, 1], [], []>} : vector<256x128xbf16>, vector<128x128xbf16>, vector<256x128xf32> -> vector<256x128xf32>
    %c0_4 = arith.constant 0 : index
    %c0_5 = arith.constant 0 : index
    %c0_6 = arith.constant 0 : index
    %4 = vector.load %arg3[%c0_4, %c0_5, %c0_6] : memref<4x1x128xf32, #tpu.memory_space<vmem>>, vector<1x1x128xf32>
    %5 = vector.shape_cast %4 : vector<1x1x128xf32> to vector<1x128xf32>
    %6 = vector.broadcast %5 : vector<1x128xf32> to vector<256x128xf32>
    %7 = arith.addf %3, %6 : vector<256x128xf32>
    %cst_7 = arith.constant 0.000000e+00 : f32
    %8 = vector.broadcast %cst_7 : f32 to vector<256x128xf32>
    %9 = arith.cmpf oge, %7, %8 : vector<256x128xf32>
    %cst_8 = arith.constant 0.00999999977 : f32
    %10 = vector.broadcast %cst_8 : f32 to vector<256x128xf32>
    %11 = arith.mulf %10, %7 : vector<256x128xf32>
    %12 = arith.select %9, %7, %11 : vector<256x128xi1>, vector<256x128xf32>
    %13 = arith.truncf %12 : vector<256x128xf32> to vector<256x128xbf16>
    %c1 = arith.constant 1 : index
    %c0_9 = arith.constant 0 : index
    %c0_10 = arith.constant 0 : index
    %14 = vector.load %arg2[%c1, %c0_9, %c0_10] : memref<4x128x128xbf16, #tpu.memory_space<vmem>>, vector<1x128x128xbf16>
    %15 = vector.shape_cast %14 : vector<1x128x128xbf16> to vector<128x128xbf16>
    %cst_11 = arith.constant dense<0.000000e+00> : vector<256x128xf32>
    %16 = tpu.matmul %13, %15, %cst_11 {dimension_numbers = #tpu.dot_dimension_numbers<[1], [0], [0], [1], [0, 0, 1, 1], [], []>} : vector<256x128xbf16>, vector<128x128xbf16>, vector<256x128xf32> -> vector<256x128xf32>
    %c1_12 = arith.constant 1 : index
    %c0_13 = arith.constant 0 : index
    %c0_14 = arith.constant 0 : index
    %17 = vector.load %arg3[%c1_12, %c0_13, %c0_14] : memref<4x1x128xf32, #tpu.memory_space<vmem>>, vector<1x1x128xf32>
    %18 = vector.shape_cast %17 : vector<1x1x128xf32> to vector<1x128xf32>
    %19 = vector.broadcast %18 : vector<1x128xf32> to vector<256x128xf32>
    %20 = arith.addf %16, %19 : vector<256x128xf32>
    %cst_15 = arith.constant 0.000000e+00 : f32
    %21 = vector.broadcast %cst_15 : f32 to vector<256x128xf32>
    %22 = arith.maximumf %20, %21 : vector<256x128xf32>
    %23 = arith.truncf %22 : vector<256x128xf32> to vector<256x128xbf16>
    %c2 = arith.constant 2 : index
    %c0_16 = arith.constant 0 : index
    %c0_17 = arith.constant 0 : index
    %24 = vector.load %arg2[%c2, %c0_16, %c0_17] : memref<4x128x128xbf16, #tpu.memory_space<vmem>>, vector<1x128x128xbf16>
    %25 = vector.shape_cast %24 : vector<1x128x128xbf16> to vector<128x128xbf16>
    %cst_18 = arith.constant dense<0.000000e+00> : vector<256x128xf32>
    %26 = tpu.matmul %23, %25, %cst_18 {dimension_numbers = #tpu.dot_dimension_numbers<[1], [0], [0], [1], [0, 0, 1, 1], [], []>} : vector<256x128xbf16>, vector<128x128xbf16>, vector<256x128xf32> -> vector<256x128xf32>
    %c2_19 = arith.constant 2 : index
    %c0_20 = arith.constant 0 : index
    %c0_21 = arith.constant 0 : index
    %27 = vector.load %arg3[%c2_19, %c0_20, %c0_21] : memref<4x1x128xf32, #tpu.memory_space<vmem>>, vector<1x1x128xf32>
    %28 = vector.shape_cast %27 : vector<1x1x128xf32> to vector<1x128xf32>
    %29 = vector.broadcast %28 : vector<1x128xf32> to vector<256x128xf32>
    %30 = arith.addf %26, %29 : vector<256x128xf32>
    %cst_22 = arith.constant 0.000000e+00 : f32
    %31 = vector.broadcast %cst_22 : f32 to vector<256x128xf32>
    %32 = arith.maximumf %30, %31 : vector<256x128xf32>
    %33 = arith.truncf %32 : vector<256x128xf32> to vector<256x128xbf16>
    %c3 = arith.constant 3 : index
    %c0_23 = arith.constant 0 : index
    %c0_24 = arith.constant 0 : index
    %34 = vector.load %arg2[%c3, %c0_23, %c0_24] : memref<4x128x128xbf16, #tpu.memory_space<vmem>>, vector<1x128x128xbf16>
    %35 = vector.shape_cast %34 : vector<1x128x128xbf16> to vector<128x128xbf16>
    %cst_25 = arith.constant dense<0.000000e+00> : vector<256x128xf32>
    %36 = tpu.matmul %33, %35, %cst_25 {dimension_numbers = #tpu.dot_dimension_numbers<[1], [0], [0], [1], [0, 0, 1, 1], [], []>} : vector<256x128xbf16>, vector<128x128xbf16>, vector<256x128xf32> -> vector<256x128xf32>
    %c3_26 = arith.constant 3 : index
    %c0_27 = arith.constant 0 : index
    %c0_28 = arith.constant 0 : index
    %37 = vector.load %arg3[%c3_26, %c0_27, %c0_28] : memref<4x1x128xf32, #tpu.memory_space<vmem>>, vector<1x1x128xf32>
    %38 = vector.shape_cast %37 : vector<1x1x128xf32> to vector<1x128xf32>
    %39 = vector.broadcast %38 : vector<1x128xf32> to vector<256x128xf32>
    %40 = arith.addf %36, %39 : vector<256x128xf32>
    %c0_29 = arith.constant 0 : index
    %c0_30 = arith.constant 0 : index
    %41 = vector.load %arg4[%c0_29, %c0_30] : memref<256x128xf32, #tpu.memory_space<vmem>>, vector<256x128xf32>
    tpu.vector_store %arg4[%c0_29, %c0_30], %40 {strides = array<i32>} : memref<256x128xf32, #tpu.memory_space<vmem>>, vector<256x128xf32>,
    return
  }
  func.func @transform_0(%arg0: i32) -> (i32, i32) {
    %c0_i32 = arith.constant 0 : i32
    %c0_i32_0 = arith.constant 0 : i32
    return %arg0, %c0_i32 : i32, i32
  }
  func.func @transform_1(%arg0: i32) -> (i32, i32, i32) {
    %c0_i32 = arith.constant 0 : i32
    %c0_i32_0 = arith.constant 0 : i32
    %c0_i32_1 = arith.constant 0 : i32
    %c0_i32_2 = arith.constant 0 : i32
    return %c0_i32, %c0_i32_0, %c0_i32_1 : i32, i32, i32
  }
  func.func @transform_2(%arg0: i32) -> (i32, i32, i32) {
    %c0_i32 = arith.constant 0 : i32
    %c0_i32_0 = arith.constant 0 : i32
    %c0_i32_1 = arith.constant 0 : i32
    %c0_i32_2 = arith.constant 0 : i32
    return %c0_i32, %c0_i32_0, %c0_i32_1 : i32, i32, i32
  }
  func.func @transform_3(%arg0: i32) -> (i32, i32) {
    %c0_i32 = arith.constant 0 : i32
    %c0_i32_0 = arith.constant 0 : i32
    return %arg0, %c0_i32 : i32, i32
  }
}

</mosaic_0001>

<bundles_post_ra>
// kernel: mlp_forward.1
= control target key start
LH: loop header
LB: loop body
LE: loop exit
PB: predicated region body
PF: predicated region fallthrough
CT: control target
= control target key end

     0   :  { %s2019_s12 = smov 0   ;;  %s2336_s0 = inlined_call_operand.vmem [shape: bf16[512,128], index: 0, kind: input, shape index: {}]   ;;  %s2337_s1 = inlined_call_operand.vmem [shape: bf16[4,128,128], index: 1, kind: input, shape index: {}]   ;;  %s2338_s2 = inlined_call_operand.vmem [shape: f32[4,1,128], index: 2, kind: input, shape index: {}]   ;;  %s2339_s3 = inlined_call_operand.vmem [shape: f32[512,128], index: 3, kind: output, shape index: {}]  }
   0x1 LB: > { %s1533_s13 = sadd.s32 4294967295, %s1997_s12   ;;  %p1537_p0 = scmp.ge.s32.totalorder %s1997_s12, 1  ;;  %s1997_s12 = sphi %s2019_s12, %s13_s12  }
   0x2   : > { %p138_p1 = scmp.lt.s32.totalorder %s1997_s12, 3 }
   0x4   : > { %p139_p2 = pnand %p1537_p0, %p138_p1 }
   0x5   : > { %s1538_s16 = sshll.u32 (!%p139_p2), %s1533_s13, 5 }
   0x6   : > { %142 = sbr.rel (%p139_p2) target bundleno = 921 (0x399), region = 32  ;;  %p163_p3 = scmp.lt.s32.totalorder (!%p139_p2), %s1538_s16, 63 }
   0xb   : > { %v1943_v0 = vld [vmem:[%s2337_s1 + $0x38] sm:$0xff]   ;;  %v1944_v1 = vld [vmem:[%s2337_s1 + $0x30] sm:$0xff]   ;;  %s2341_s16 = smov (!%p163_p3, %s1538_s16), 63  ;;  %v1945_v2 = vld [vmem:[%s2337_s1 + $0x28] sm:$0xff]  }
   0xc   : > { %1743 = vmatprep.subr.bf16.mxu0 %v1943_v0  ;;  %s1539_s21 = sshll.u32 %s2341_s16, 2  ;;  %v1946_v3 = vld [vmem:[%s2337_s1 + $0x20] sm:$0xff]   ;;  %v1947_v5 = vld [vmem:[%s2337_s1 + $0x18] sm:$0xff]   ;;  %v1948_v6 = vld [vmem:[%s2337_s1 + $0x10] sm:$0xff]   ;;  %s1541_s13 = sshll.u32 %s2341_s16, 3 }
   0xd   : > { %1744 = vmatpush3.bf16.msra.mxu0 %v1943_v0  ;;  %s2042_s24 = scalar_lea.vmem %s2336_s0, %s1539_s21  ;;  %v1949_v7 = vld [vmem:[%s2337_s1 + $0x8] sm:$0xff]   ;;  %v1950_v8 = vld [vmem:[%s2337_s1] sm:$0xff]   ;;  %v1967_v9 = vld [vmem:[%s2337_s1 + $0x78] sm:$0xff]   ;;  %s2267_s19 = scalar_lea.vmem %s2339_s3, %s1541_s13 }
   0xe   : > { %1745 = vmatprep.subr.bf16.mxu0 %v1944_v1  ;;  %v1951_v4 = vld [vmem:[%s2042_s24] sm:$0xff]   ;;  %v1968_v10 = vld [vmem:[%s2337_s1 + $0x70] sm:$0xff]   ;;  %1791 = vmatprep.subr.bf16.mxu1 %v1967_v9  ;;  %v1952_v11 = vld [vmem:[%s2042_s24 + $0x8] sm:$0xff]  }
   0xf   : > { %1759 = vmatprep.mubr.bf16.mxu0 %v1951_v4  ;;  %1792 = vmatpush3.bf16.msra.mxu1 %v1967_v9  ;;  %v1969_v12 = vld [vmem:[%s2337_s1 + $0x68] sm:$0xff]   ;;  %v1953_v13 = vld [vmem:[%s2042_s24 + $0x10] sm:$0xff]   ;;  %v1970_v14 = vld [vmem:[%s2337_s1 + $0x60] sm:$0xff]  }
  0x10   : > { %1793 = vmatprep.subr.bf16.mxu1 %v1968_v10  ;;  %v1971_v15 = vld [vmem:[%s2337_s1 + $0x58] sm:$0xff]   ;;  %v1955_v17 = vld [vmem:[%s2042_s24 + $0x20] sm:$0xff]   ;;  %v1956_v18 = vld [vmem:[%s2042_s24 + $0x28] sm:$0xff]  }
  0x11   : > { %1746 = vmatpush3.bf16.msra.mxu0 %v1944_v1  ;;  %v1954_v16 = vld [vmem:[%s2042_s24 + $0x18] sm:$0xff]   ;;  %v1957_v19 = vld [vmem:[%s2042_s24 + $0x30] sm:$0xff]   ;;  %v1959_v21 = vld [vmem:[%s2042_s24 + $0x40] sm:$0xff]  }
  0x12   : > { %1747 = vmatprep.subr.bf16.mxu0 %v1945_v2  ;;  %v1958_v20 = vld [vmem:[%s2042_s24 + $0x38] sm:$0xff]   ;;  %v1960_v22 = vld [vmem:[%s2042_s24 + $0x48] sm:$0xff]   ;;  %v1961_v23 = vld [vmem:[%s2042_s24 + $0x50] sm:$0xff]  }
  0x13   : > { %1794 = vmatpush3.bf16.msra.mxu1 %v1968_v10  ;;  %v1962_v24 = vld [vmem:[%s2042_s24 + $0x58] sm:$0xff]   ;;  %v1963_v25 = vld [vmem:[%s2042_s24 + $0x60] sm:$0xff]   ;;  %v1964_v26 = vld [vmem:[%s2042_s24 + $0x68] sm:$0xff]  }
  0x14   : > { %1795 = vmatprep.subr.bf16.mxu1 %v1969_v12  ;;  %v1965_v27 = vld [vmem:[%s2042_s24 + $0x70] sm:$0xff]   ;;  %v1966_v28 = vld [vmem:[%s2042_s24 + $0x78] sm:$0xff]   ;;  %v1973_v30 = vld [vmem:[%s2337_s1 + $0x48] sm:$0xff]  }
  0x15   : > { %1748 = vmatpush3.bf16.msra.mxu0 %v1945_v2  ;;  %v1972_v29 = vld [vmem:[%s2337_s1 + $0x50] sm:$0xff]   ;;  %v1974_v31 = vld [vmem:[%s2337_s1 + $0x40] sm:$0xff]   ;;  %v1975_v32 = vld [vmem:[%s2337_s1 + $0xb8] sm:$0xff]  }
  0x16   : > { %1749 = vmatprep.subr.bf16.mxu0 %v1946_v3  ;;  %v1976_v33 = vld [vmem:[%s2337_s1 + $0xb0] sm:$0xff]   ;;  %v1977_v34 = vld [vmem:[%s2337_s1 + $0xa8] sm:$0xff]   ;;  %v1978_v35 = vld [vmem:[%s2337_s1 + $0xa0] sm:$0xff]  }
  0x17   : > { %1796 = vmatpush3.bf16.msra.mxu1 %v1969_v12  ;;  %v1979_v36 = vld [vmem:[%s2337_s1 + $0x98] sm:$0xff]   ;;  %v1980_v37 = vld [vmem:[%s2337_s1 + $0x90] sm:$0xff]   ;;  %v1981_v38 = vld [vmem:[%s2337_s1 + $0x88] sm:$0xff]  }
  0x18   : > { %1797 = vmatprep.subr.bf16.mxu1 %v1970_v14  ;;  %v2123_v40 = vld [vmem:[%s2338_s2] ss:$0 sm:$0xff] }
  0x19   : > { %1750 = vmatpush3.bf16.msra.mxu0 %v1946_v3 }
  0x1a   : > { %1751 = vmatprep.subr.bf16.mxu0 %v1947_v5 }
  0x1b   : > { %1798 = vmatpush3.bf16.msra.mxu1 %v1970_v14 }
  0x1c   : > { %1799 = vmatprep.subr.bf16.mxu1 %v1971_v15 }
  0x1d   : > { %1752 = vmatpush3.bf16.msra.mxu0 %v1947_v5 }
  0x1e   : > { %1753 = vmatprep.subr.bf16.mxu0 %v1948_v6 }
  0x1f   : > { %1800 = vmatpush3.bf16.msra.mxu1 %v1971_v15 }
  0x20   : > { %1801 = vmatprep.subr.bf16.mxu1 %v1972_v29 }
  0x21   : > { %1754 = vmatpush3.bf16.msra.mxu0 %v1948_v6 }
  0x22   : > { %1755 = vmatprep.subr.bf16.mxu0 %v1949_v7 }
  0x23   : > { %1802 = vmatpush3.bf16.msra.mxu1 %v1972_v29 }
  0x24   : > { %1803 = vmatprep.subr.bf16.mxu1 %v1973_v30 }
  0x25   : > { %1756 = vmatpush3.bf16.msra.mxu0 %v1949_v7 }
  0x26   : > { %1757 = vmatprep.subr.bf16.mxu0 %v1950_v8 }
  0x27   : > { %1804 = vmatpush3.bf16.msra.mxu1 %v1973_v30 }
  0x28   : > { %1805 = vmatprep.subr.bf16.mxu1 %v1974_v31 }
  0x29   : > { %1758 = vmatpush3.bf16.msra.mxu0 %v1950_v8 }
  0x2a   : > { %1839 = vmatprep.subr.bf16.mxu0 %v1975_v32 }
  0x2b   : > { %1806 = vmatpush3.bf16.msra.mxu1 %v1974_v31 }
  0x2c   : > { %1760 = vmatmul.mubr.bf16.vlgmr.msra.gmra.mxu0 %v1952_v11 }
  0x2d   : > { %1763 = vmatprep.mubr.bf16.mxu0 %v1953_v13  ;;  %1840 = vmatpush3.bf16.msra.mxu0 %v1975_v32 }
  0x2e   : > { %1841 = vmatprep.subr.bf16.mxu0 %v1976_v33 }
  0x31   : > { %1842 = vmatpush3.bf16.msra.mxu0 %v1976_v33 }
  0x32   : > { %1843 = vmatprep.subr.bf16.mxu0 %v1977_v34 }
  0x34   : > { %1764 = vmatmul.mubr.bf16.gmra.mxu0 %v1954_v16 }
  0x35   : > { %1767 = vmatprep.mubr.bf16.mxu0 %v1955_v17  ;;  %1844 = vmatpush3.bf16.msra.mxu0 %v1977_v34 }
  0x36   : > { %1845 = vmatprep.subr.bf16.mxu0 %v1978_v35 }
  0x39   : > { %1846 = vmatpush3.bf16.msra.mxu0 %v1978_v35 }
  0x3a   : > { %1847 = vmatprep.subr.bf16.mxu0 %v1979_v36 }
  0x3c   : > { %1768 = vmatmul.mubr.bf16.gmra.mxu0 %v1956_v18 }
  0x3d   : > { %1771 = vmatprep.mubr.bf16.mxu0 %v1957_v19  ;;  %1848 = vmatpush3.bf16.msra.mxu0 %v1979_v36 }
  0x3e   : > { %1849 = vmatprep.subr.bf16.mxu0 %v1980_v37 }
  0x41   : > { %1850 = vmatpush3.bf16.msra.mxu0 %v1980_v37 }
  0x42   : > { %1851 = vmatprep.subr.bf16.mxu0 %v1981_v38 }
  0x44   : > { %1772 = vmatmul.mubr.bf16.gmra.mxu0 %v1958_v20 }
  0x45   : > { %1775 = vmatprep.mubr.bf16.mxu0 %v1959_v21  ;;  %1852 = vmatpush3.bf16.msra.mxu0 %v1981_v38 }
  0x4c   : > { %1776 = vmatmul.mubr.bf16.gmra.mxu0 %v1960_v22 }
  0x4d   : > { %1779 = vmatprep.mubr.bf16.mxu0 %v1961_v23 }
  0x54   : > { %1780 = vmatmul.mubr.bf16.gmra.mxu0 %v1962_v24 }
  0x55   : > { %1783 = vmatprep.mubr.bf16.mxu0 %v1963_v25 }
  0x5c   : > { %1784 = vmatmul.mubr.bf16.gmra.mxu0 %v1964_v26 }
  0x5d   : > { %1787 = vmatprep.mubr.bf16.mxu0 %v1965_v27 }
  0x64   : > { %1788 = vmatmul.mubr.bf16.gmra.mxu0 %v1966_v28 }
  0xec   : > { %v1761_v39 = vpop.f32.mrf.mxu0 }
  0xed   : > { %v417_v43 = vadd.f32 %v1761_v39, %v2123_v40 }
  0xee   : > { %v408_v41 = vpop.f32.mrf.mxu0 }
  0xef   : > { %v409_v42 = vadd.f32 %v2123_v40, %v408_v41  ;;  %v569_v50 = vmul.f32 0.01, %v417_v43  ;;  %vm537_vm2 = vcmp.ge.f32.partialorder %v417_v43, 0.0 }
  0xf0   : > { %v1762_v44 = vpop.f32.mrf.mxu0 }
  0xf1   : > { %v420_v45 = vadd.f32 %v1762_v44, %v2123_v40  ;;  %v567_v47 = vmul.f32 0.01, %v409_v42  ;;  %vm535_vm1 = vcmp.ge.f32.partialorder %v409_v42, 0.0  ;;  %v601_v61 = vsel %vm537_vm2, %v417_v43, %v569_v50 }
  0xf2   : > { %v411_v46 = vpop.f32.mrf.mxu0 }
  0xf3   : > { %vm538_vm0 = vcmp.ge.f32.partialorder %v420_v45, 0.0  ;;  %v570_v48 = vmul.f32 0.01, %v420_v45  ;;  %v412_v49 = vadd.f32 %v2123_v40, %v411_v46  ;;  %v599_v56 = vsel %vm535_vm1, %v409_v42, %v567_v47 }
  0xf4   : > { %v1765_v51 = vpop.f32.mrf.mxu0 }
  0xf5   : > { %v568_v52 = vmul.f32 0.01, %v412_v49  ;;  %vm536_vm3 = vcmp.ge.f32.partialorder %v412_v49, 0.0  ;;  %v602_v54 = vsel %vm538_vm0, %v420_v45, %v570_v48  ;;  %v433_v58 = vadd.f32 %v1765_v51, %v2123_v40 }
  0xf6   : > { %v424_v53 = vpop.f32.mrf.mxu0  ;;  %v632_v63 = vpack.c.bf16 %v602_v54, %v601_v61 }
  0xf7   : > { %v425_v55 = vadd.f32 %v2123_v40, %v424_v53  ;;  %v600_v57 = vsel %vm536_vm3, %v412_v49, %v568_v52  ;;  %v573_v4 = vmul.f32 0.01, %v433_v58  ;;  %vm541_vm6 = vcmp.ge.f32.partialorder %v433_v58, 0.0 }
  0xf8   : > { %v1766_v59 = vpop.f32.mrf.mxu0  ;;  %v631_v60 = vpack.c.bf16 %v600_v57, %v599_v56 }
  0xf9   : > { %v436_v62 = vadd.f32 %v1766_v59, %v2123_v40  ;;  %v571_v1 = vmul.f32 0.01, %v425_v55  ;;  %vm539_vm5 = vcmp.ge.f32.partialorder %v425_v55, 0.0  ;;  %v605_v15 = vsel %vm541_vm6, %v433_v58, %v573_v4 }
  0xfa   : > { %v427_v0 = vpop.f32.mrf.mxu0  ;;  %1807 = vmatprep.mubr.bf16.mxu1 %v631_v60 }
  0xfb   : > { %vm542_vm4 = vcmp.ge.f32.partialorder %v436_v62, 0.0  ;;  %v574_v2 = vmul.f32 0.01, %v436_v62  ;;  %v428_v3 = vadd.f32 %v2123_v40, %v427_v0  ;;  %1808 = vmatmul.mubr.bf16.vlgmr.msra.gmra.mxu1 %v632_v63  ;;  %v603_v10 = vsel %vm539_vm5, %v425_v55, %v571_v1 }
  0xfc   : > { %v1769_v5 = vpop.f32.mrf.mxu0 }
  0xfd   : > { %vm540_vm7 = vcmp.ge.f32.partialorder %v428_v3, 0.0  ;;  %v572_v6 = vmul.f32 0.01, %v428_v3  ;;  %v606_v8 = vsel %vm542_vm4, %v436_v62, %v574_v2  ;;  %v449_v12 = vadd.f32 %v1769_v5, %v2123_v40 }
  0xfe   : > { %v440_v7 = vpop.f32.mrf.mxu0  ;;  %v634_v17 = vpack.c.bf16 %v606_v8, %v605_v15 }
  0xff   : > { %v441_v9 = vadd.f32 %v2123_v40, %v440_v7  ;;  %v604_v11 = vsel %vm540_vm7, %v428_v3, %v572_v6  ;;  %v577_v22 = vmul.f32 0.01, %v449_v12  ;;  %vm545_vm10 = vcmp.ge.f32.partialorder %v449_v12, 0.0 }
 0x100   : > { %v1770_v13 = vpop.f32.mrf.mxu0  ;;  %v633_v14 = vpack.c.bf16 %v604_v11, %v603_v10 }
 0x101   : > { %v452_v16 = vadd.f32 %v1770_v13, %v2123_v40  ;;  %v575_v19 = vmul.f32 0.01, %v441_v9  ;;  %vm543_vm9 = vcmp.ge.f32.partialorder %v441_v9, 0.0  ;;  %v609_v33 = vsel %vm545_vm10, %v449_v12, %v577_v22 }
 0x102   : > { %v443_v18 = vpop.f32.mrf.mxu0  ;;  %1811 = vmatprep.mubr.bf16.mxu1 %v633_v14 }
 0x103   : > { %vm546_vm8 = vcmp.ge.f32.partialorder %v452_v16, 0.0  ;;  %v578_v20 = vmul.f32 0.01, %v452_v16  ;;  %v444_v21 = vadd.f32 %v2123_v40, %v443_v18  ;;  %1812 = vmatmul.mubr.bf16.gmra.mxu1 %v634_v17  ;;  %v607_v28 = vsel %vm543_vm9, %v441_v9, %v575_v19 }
 0x104   : > { %v1773_v23 = vpop.f32.mrf.mxu0 }
 0x105   : > { %vm544_vm11 = vcmp.ge.f32.partialorder %v444_v21, 0.0  ;;  %v576_v24 = vmul.f32 0.01, %v444_v21  ;;  %v610_v26 = vsel %vm546_vm8, %v452_v16, %v578_v20  ;;  %v465_v30 = vadd.f32 %v1773_v23, %v2123_v40 }
 0x106   : > { %v456_v25 = vpop.f32.mrf.mxu0  ;;  %v636_v35 = vpack.c.bf16 %v610_v26, %v609_v33 }
 0x107   : > { %v457_v27 = vadd.f32 %v2123_v40, %v456_v25  ;;  %v608_v29 = vsel %vm544_vm11, %v444_v21, %v576_v24  ;;  %v581_v41 = vmul.f32 0.01, %v465_v30  ;;  %vm549_vm14 = vcmp.ge.f32.partialorder %v465_v30, 0.0 }
 0x108   : > { %v1774_v31 = vpop.f32.mrf.mxu0  ;;  %v635_v32 = vpack.c.bf16 %v608_v29, %v607_v28 }
 0x109   : > { %v468_v34 = vadd.f32 %v1774_v31, %v2123_v40  ;;  %v579_v37 = vmul.f32 0.01, %v457_v27  ;;  %vm547_vm13 = vcmp.ge.f32.partialorder %v457_v27, 0.0  ;;  %v613_v52 = vsel %vm549_vm14, %v465_v30, %v581_v41 }
 0x10a   : > { %v459_v36 = vpop.f32.mrf.mxu0  ;;  %1815 = vmatprep.mubr.bf16.mxu1 %v635_v32 }
 0x10b   : > { %vm550_vm12 = vcmp.ge.f32.partialorder %v468_v34, 0.0  ;;  %v582_v38 = vmul.f32 0.01, %v468_v34  ;;  %v460_v39 = vadd.f32 %v2123_v40, %v459_v36  ;;  %1816 = vmatmul.mubr.bf16.gmra.mxu1 %v636_v35  ;;  %v611_v47 = vsel %vm547_vm13, %v457_v27, %v579_v37 }
 0x10c   : > { %v1777_v42 = vpop.f32.mrf.mxu0 }
 0x10d   : > { %vm548_vm15 = vcmp.ge.f32.partialorder %v460_v39, 0.0  ;;  %v580_v43 = vmul.f32 0.01, %v460_v39  ;;  %v614_v45 = vsel %vm550_vm12, %v468_v34, %v582_v38  ;;  %v481_v49 = vadd.f32 %v1777_v42, %v2123_v40 }
 0x10e   : > { %v472_v44 = vpop.f32.mrf.mxu0  ;;  %v638_v54 = vpack.c.bf16 %v614_v45, %v613_v52 }
 0x10f   : > { %v473_v46 = vadd.f32 %v2123_v40, %v472_v44  ;;  %v612_v48 = vsel %vm548_vm15, %v460_v39, %v580_v43  ;;  %v585_v59 = vmul.f32 0.01, %v481_v49  ;;  %vm553_vm2 = vcmp.ge.f32.partialorder %v481_v49, 0.0 }
 0x110   : > { %v1778_v50 = vpop.f32.mrf.mxu0  ;;  %v637_v51 = vpack.c.bf16 %v612_v48, %v611_v47 }
 0x111   : > { %v484_v53 = vadd.f32 %v1778_v50, %v2123_v40  ;;  %v583_v56 = vmul.f32 0.01, %v473_v46  ;;  %vm551_vm1 = vcmp.ge.f32.partialorder %v473_v46, 0.0  ;;  %v617_v6 = vsel %vm553_vm2, %v481_v49, %v585_v59  ;;  %v1984_v59 = vld [vmem:[%s2337_s1 + $0xf0] sm:$0xff]  }
 0x112   : > { %v475_v55 = vpop.f32.mrf.mxu0  ;;  %1819 = vmatprep.mubr.bf16.mxu1 %v637_v51 }
 0x113   : > { %vm554_vm0 = vcmp.ge.f32.partialorder %v484_v53, 0.0  ;;  %v586_v57 = vmul.f32 0.01, %v484_v53  ;;  %v476_v58 = vadd.f32 %v2123_v40, %v475_v55  ;;  %1820 = vmatmul.mubr.bf16.gmra.mxu1 %v638_v54  ;;  %v615_v1 = vsel %vm551_vm1, %v473_v46, %v583_v56 }
 0x114   : > { %v1781_v60 = vpop.f32.mrf.mxu0 }
 0x115   : > { %vm552_vm3 = vcmp.ge.f32.partialorder %v476_v58, 0.0  ;;  %v584_v61 = vmul.f32 0.01, %v476_v58  ;;  %v618_v63 = vsel %vm554_vm0, %v484_v53, %v586_v57  ;;  %v497_v3 = vadd.f32 %v1781_v60, %v2123_v40  ;;  %v1985_v60 = vld [vmem:[%s2337_s1 + $0xe8] sm:$0xff]  }
 0x116   : > { %v488_v62 = vpop.f32.mrf.mxu0  ;;  %v640_v8 = vpack.c.bf16 %v618_v63, %v617_v6  ;;  %v1988_v63 = vld [vmem:[%s2337_s1 + $0xd0] sm:$0xff]  }
 0x117   : > { %v489_v0 = vadd.f32 %v2123_v40, %v488_v62  ;;  %v616_v2 = vsel %vm552_vm3, %v476_v58, %v584_v61  ;;  %v589_v13 = vmul.f32 0.01, %v497_v3  ;;  %vm557_vm6 = vcmp.ge.f32.partialorder %v497_v3, 0.0  ;;  %v1982_v58 = vld [vmem:[%s2337_s1 + $0x80] sm:$0xff]   ;;  %v1987_v62 = vld [vmem:[%s2337_s1 + $0xd8] sm:$0xff]  }
 0x118   : > { %v1782_v4 = vpop.f32.mrf.mxu0  ;;  %v639_v5 = vpack.c.bf16 %v616_v2, %v615_v1  ;;  %1853 = vmatprep.subr.bf16.mxu0 %v1982_v58  ;;  %v1986_v61 = vld [vmem:[%s2337_s1 + $0xe0] sm:$0xff]  }
 0x119   : > { %v500_v7 = vadd.f32 %v1782_v4, %v2123_v40  ;;  %v587_v10 = vmul.f32 0.01, %v489_v0  ;;  %vm555_vm5 = vcmp.ge.f32.partialorder %v489_v0, 0.0  ;;  %v621_v24 = vsel %vm557_vm6, %v497_v3, %v589_v13  ;;  %1854 = vmatpush3.bf16.msra.mxu0 %v1982_v58  ;;  %v2184_v3 = vld [vmem:[%s2338_s2 + $0x1] ss:$0 sm:$0xff] }
 0x11a   : > { %v491_v9 = vpop.f32.mrf.mxu0  ;;  %1823 = vmatprep.mubr.bf16.mxu1 %v639_v5 }
 0x11b   : > { %vm558_vm4 = vcmp.ge.f32.partialorder %v500_v7, 0.0  ;;  %v590_v11 = vmul.f32 0.01, %v500_v7  ;;  %v492_v12 = vadd.f32 %v2123_v40, %v491_v9  ;;  %1824 = vmatmul.mubr.bf16.gmra.mxu1 %v640_v8  ;;  %v619_v19 = vsel %vm555_vm5, %v489_v0, %v587_v10  ;;  %v1989_v0 = vld [vmem:[%s2337_s1 + $0xc8] sm:$0xff]  }
 0x11c   : > { %v1785_v14 = vpop.f32.mrf.mxu0 }
 0x11d   : > { %vm556_vm7 = vcmp.ge.f32.partialorder %v492_v12, 0.0  ;;  %v588_v15 = vmul.f32 0.01, %v492_v12  ;;  %v622_v17 = vsel %vm558_vm4, %v500_v7, %v590_v11  ;;  %v513_v21 = vadd.f32 %v1785_v14, %v2123_v40 }
 0x11e   : > { %v504_v16 = vpop.f32.mrf.mxu0  ;;  %v642_v26 = vpack.c.bf16 %v622_v17, %v621_v24 }
 0x11f   : > { %v505_v18 = vadd.f32 %v2123_v40, %v504_v16  ;;  %v620_v20 = vsel %vm556_vm7, %v492_v12, %v588_v15  ;;  %v593_v31 = vmul.f32 0.01, %v513_v21  ;;  %vm561_vm10 = vcmp.ge.f32.partialorder %v513_v21, 0.0 }
 0x120   : > { %v1786_v22 = vpop.f32.mrf.mxu0  ;;  %v641_v23 = vpack.c.bf16 %v620_v20, %v619_v19 }
 0x121   : > { %v516_v25 = vadd.f32 %v1786_v22, %v2123_v40  ;;  %v591_v28 = vmul.f32 0.01, %v505_v18  ;;  %vm559_vm9 = vcmp.ge.f32.partialorder %v505_v18, 0.0  ;;  %v625_v43 = vsel %vm561_vm10, %v513_v21, %v593_v31 }
 0x122   : > { %v507_v27 = vpop.f32.mrf.mxu0  ;;  %1827 = vmatprep.mubr.bf16.mxu1 %v641_v23 }
 0x123   : > { %vm562_vm8 = vcmp.ge.f32.partialorder %v516_v25, 0.0  ;;  %v594_v29 = vmul.f32 0.01, %v516_v25  ;;  %v508_v30 = vadd.f32 %v2123_v40, %v507_v27  ;;  %1828 = vmatmul.mubr.bf16.gmra.mxu1 %v642_v26  ;;  %v623_v37 = vsel %vm559_vm9, %v505_v18, %v591_v28 }
 0x124   : > { %v1789_v32 = vpop.f32.mrf.mxu0 }
 0x125   : > { %vm560_vm11 = vcmp.ge.f32.partialorder %v508_v30, 0.0  ;;  %v592_v33 = vmul.f32 0.01, %v508_v30  ;;  %v626_v35 = vsel %vm562_vm8, %v516_v25, %v594_v29  ;;  %v529_v39 = vadd.f32 %v1789_v32, %v2123_v40 }
 0x126   : > { %v520_v34 = vpop.f32.mrf.mxu0  ;;  %v644_v45 = vpack.c.bf16 %v626_v35, %v625_v43 }
 0x127   : > { %v521_v36 = vadd.f32 %v2123_v40, %v520_v34  ;;  %v624_v38 = vsel %vm560_vm11, %v508_v30, %v592_v33  ;;  %v597_v50 = vmul.f32 0.01, %v529_v39  ;;  %vm565_vm14 = vcmp.ge.f32.partialorder %v529_v39, 0.0 }
 0x128   : > { %v1790_v41 = vpop.f32.mrf.mxu0  ;;  %v643_v42 = vpack.c.bf16 %v624_v38, %v623_v37 }
 0x129   : > { %v532_v44 = vadd.f32 %v1790_v41, %v2123_v40  ;;  %v595_v47 = vmul.f32 0.01, %v521_v36  ;;  %vm563_vm13 = vcmp.ge.f32.partialorder %v521_v36, 0.0  ;;  %v629_v56 = vsel %vm565_vm14, %v529_v39, %v597_v50 }
 0x12a   : > { %v523_v46 = vpop.f32.mrf.mxu0  ;;  %1831 = vmatprep.mubr.bf16.mxu1 %v643_v42 }
 0x12b   : > { %vm566_vm12 = vcmp.ge.f32.partialorder %v532_v44, 0.0  ;;  %v598_v48 = vmul.f32 0.01, %v532_v44  ;;  %v524_v49 = vadd.f32 %v2123_v40, %v523_v46  ;;  %1832 = vmatmul.mubr.bf16.gmra.mxu1 %v644_v45  ;;  %v627_v53 = vsel %vm563_vm13, %v521_v36, %v595_v47  ;;  %v1983_v40 = vld [vmem:[%s2337_s1 + $0xf8] sm:$0xff]  }
 0x12c   : > { %1887 = vmatprep.subr.bf16.mxu1 %v1983_v40 }
 0x12d   : > { %vm564_vm15 = vcmp.ge.f32.partialorder %v524_v49, 0.0  ;;  %v596_v51 = vmul.f32 0.01, %v524_v49  ;;  %v630_v52 = vsel %vm566_vm12, %v532_v44, %v598_v48  ;;  %1888 = vmatpush3.bf16.msra.mxu1 %v1983_v40 }
 0x12e   : > { %v646_v57 = vpack.c.bf16 %v630_v52, %v629_v56  ;;  %1889 = vmatprep.subr.bf16.mxu1 %v1984_v59 }
 0x12f   : > { %v628_v54 = vsel %vm564_vm15, %v524_v49, %v596_v51 }
 0x130   : > { %v645_v55 = vpack.c.bf16 %v628_v54, %v627_v53 }
 0x131   : > { %1890 = vmatpush3.bf16.msra.mxu1 %v1984_v59 }
 0x132   : > { %1835 = vmatprep.mubr.bf16.mxu1 %v645_v55  ;;  %1891 = vmatprep.subr.bf16.mxu1 %v1985_v60 }
 0x133   : > { %1836 = vmatmul.mubr.bf16.gmra.mxu1 %v646_v57 }
 0x135   : > { %1892 = vmatpush3.bf16.msra.mxu1 %v1985_v60 }
 0x136   : > { %1893 = vmatprep.subr.bf16.mxu1 %v1986_v61 }
 0x139   : > { %1894 = vmatpush3.bf16.msra.mxu1 %v1986_v61 }
 0x13a   : > { %1895 = vmatprep.subr.bf16.mxu1 %v1987_v62 }
 0x13d   : > { %1896 = vmatpush3.bf16.msra.mxu1 %v1987_v62 }
 0x13e   : > { %1897 = vmatprep.subr.bf16.mxu1 %v1988_v63 }
 0x141   : > { %1898 = vmatpush3.bf16.msra.mxu1 %v1988_v63 }
 0x142   : > { %1899 = vmatprep.subr.bf16.mxu1 %v1989_v0 }
 0x145   : > { %1900 = vmatpush3.bf16.msra.mxu1 %v1989_v0 }
 0x1bb   : > { %v1809_v1 = vpop.f32.mrf.mxu1 }
 0x1bc   : > { %v763_v7 = vadd.f32 %v1809_v1, %v2184_v3 }
 0x1bd   : > { %v754_v2 = vpop.f32.mrf.mxu1 }
 0x1be   : > { %v755_v5 = vadd.f32 %v2184_v3, %v754_v2  ;;  %v883_v14 = vmax.f32 %v763_v7, 0.0 }
 0x1bf   : > { %v1810_v4 = vpop.f32.mrf.mxu1 }
 0x1c0   : > { %v766_v6 = vadd.f32 %v1810_v4, %v2184_v3  ;;  %v881_v12 = vmax.f32 %v755_v5, 0.0 }
 0x1c1   : > { %v757_v8 = vpop.f32.mrf.mxu1 }
 0x1c2   : > { %v758_v9 = vadd.f32 %v2184_v3, %v757_v8  ;;  %v884_v10 = vmax.f32 %v766_v6, 0.0 }
 0x1c3   : > { %v1813_v11 = vpop.f32.mrf.mxu1 }
 0x1c4   : > { %v882_v13 = vmax.f32 %v758_v9, 0.0  ;;  %v914_v17 = vpack.c.bf16 %v884_v10, %v883_v14  ;;  %v779_v21 = vadd.f32 %v1813_v11, %v2184_v3 }
 0x1c5   : > { %v770_v15 = vpop.f32.mrf.mxu1 }
 0x1c6   : > { %v913_v16 = vpack.c.bf16 %v882_v13, %v881_v12  ;;  %v771_v19 = vadd.f32 %v2184_v3, %v770_v15  ;;  %v887_v28 = vmax.f32 %v779_v21, 0.0 }
 0x1c7   : > { %v1814_v18 = vpop.f32.mrf.mxu1 }
 0x1c8   : > { %v782_v20 = vadd.f32 %v1814_v18, %v2184_v3  ;;  %1855 = vmatprep.mubr.bf16.mxu0 %v913_v16  ;;  %v885_v26 = vmax.f32 %v771_v19, 0.0 }
 0x1c9   : > { %v773_v22 = vpop.f32.mrf.mxu1  ;;  %1856 = vmatmul.mubr.bf16.vlgmr.msra.gmra.mxu0 %v914_v17 }
 0x1ca   : > { %v774_v23 = vadd.f32 %v2184_v3, %v773_v22  ;;  %v888_v24 = vmax.f32 %v782_v20, 0.0 }
 0x1cb   : > { %v1817_v25 = vpop.f32.mrf.mxu1 }
 0x1cc   : > { %v886_v27 = vmax.f32 %v774_v23, 0.0  ;;  %v916_v31 = vpack.c.bf16 %v888_v24, %v887_v28  ;;  %v795_v35 = vadd.f32 %v1817_v25, %v2184_v3 }
 0x1cd   : > { %v786_v29 = vpop.f32.mrf.mxu1 }
 0x1ce   : > { %v915_v30 = vpack.c.bf16 %v886_v27, %v885_v26  ;;  %v787_v33 = vadd.f32 %v2184_v3, %v786_v29  ;;  %v891_v43 = vmax.f32 %v795_v35, 0.0 }
 0x1cf   : > { %v1818_v32 = vpop.f32.mrf.mxu1 }
 0x1d0   : > { %v798_v34 = vadd.f32 %v1818_v32, %v2184_v3  ;;  %1859 = vmatprep.mubr.bf16.mxu0 %v915_v30  ;;  %v889_v41 = vmax.f32 %v787_v33, 0.0 }
 0x1d1   : > { %v789_v36 = vpop.f32.mrf.mxu1  ;;  %1860 = vmatmul.mubr.bf16.gmra.mxu0 %v916_v31 }
 0x1d2   : > { %v790_v37 = vadd.f32 %v2184_v3, %v789_v36  ;;  %v892_v38 = vmax.f32 %v798_v34, 0.0 }
 0x1d3   : > { %v1821_v39 = vpop.f32.mrf.mxu1 }
 0x1d4   : > { %v890_v42 = vmax.f32 %v790_v37, 0.0  ;;  %v918_v46 = vpack.c.bf16 %v892_v38, %v891_v43  ;;  %v811_v50 = vadd.f32 %v1821_v39, %v2184_v3 }
 0x1d5   : > { %v802_v44 = vpop.f32.mrf.mxu1 }
 0x1d6   : > { %v917_v45 = vpack.c.bf16 %v890_v42, %v889_v41  ;;  %v803_v48 = vadd.f32 %v2184_v3, %v802_v44  ;;  %v895_v57 = vmax.f32 %v811_v50, 0.0 }
 0x1d7   : > { %v1822_v47 = vpop.f32.mrf.mxu1 }
 0x1d8   : > { %v814_v49 = vadd.f32 %v1822_v47, %v2184_v3  ;;  %1863 = vmatprep.mubr.bf16.mxu0 %v917_v45  ;;  %v893_v55 = vmax.f32 %v803_v48, 0.0 }
 0x1d9   : > { %v805_v51 = vpop.f32.mrf.mxu1  ;;  %1864 = vmatmul.mubr.bf16.gmra.mxu0 %v918_v46 }
 0x1da   : > { %v806_v52 = vadd.f32 %v2184_v3, %v805_v51  ;;  %v896_v53 = vmax.f32 %v814_v49, 0.0 }
 0x1db   : > { %v1825_v54 = vpop.f32.mrf.mxu1 }
 0x1dc   : > { %v894_v56 = vmax.f32 %v806_v52, 0.0  ;;  %v920_v59 = vpack.c.bf16 %v896_v53, %v895_v57  ;;  %v827_v63 = vadd.f32 %v1825_v54, %v2184_v3  ;;  %v1990_v52 = vld [vmem:[%s2337_s1 + $0xc0] sm:$0xff]  }
 0x1dd   : > { %v818_v58 = vpop.f32.mrf.mxu1  ;;  %1901 = vmatprep.subr.bf16.mxu1 %v1990_v52 }
 0x1de   : > { %v919_v40 = vpack.c.bf16 %v894_v56, %v893_v55  ;;  %v819_v61 = vadd.f32 %v2184_v3, %v818_v58  ;;  %v899_v7 = vmax.f32 %v827_v63, 0.0  ;;  %1902 = vmatpush3.bf16.msra.mxu1 %v1990_v52 }
 0x1df   : > { %v1826_v60 = vpop.f32.mrf.mxu1 }
 0x1e0   : > { %v830_v62 = vadd.f32 %v1826_v60, %v2184_v3  ;;  %1867 = vmatprep.mubr.bf16.mxu0 %v919_v40  ;;  %v897_v5 = vmax.f32 %v819_v61, 0.0 }
 0x1e1   : > { %v821_v0 = vpop.f32.mrf.mxu1  ;;  %1868 = vmatmul.mubr.bf16.gmra.mxu0 %v920_v59 }
 0x1e2   : > { %v822_v1 = vadd.f32 %v2184_v3, %v821_v0  ;;  %v900_v2 = vmax.f32 %v830_v62, 0.0 }
 0x1e3   : > { %v1829_v4 = vpop.f32.mrf.mxu1 }
 0x1e4   : > { %v898_v6 = vmax.f32 %v822_v1, 0.0  ;;  %v922_v10 = vpack.c.bf16 %v900_v2, %v899_v7  ;;  %v843_v14 = vadd.f32 %v1829_v4, %v2184_v3 }
 0x1e5   : > { %v834_v8 = vpop.f32.mrf.mxu1 }
 0x1e6   : > { %v921_v9 = vpack.c.bf16 %v898_v6, %v897_v5  ;;  %v835_v12 = vadd.f32 %v2184_v3, %v834_v8  ;;  %v903_v21 = vmax.f32 %v843_v14, 0.0 }
 0x1e7   : > { %v1830_v11 = vpop.f32.mrf.mxu1 }
 0x1e8   : > { %v846_v13 = vadd.f32 %v1830_v11, %v2184_v3  ;;  %1871 = vmatprep.mubr.bf16.mxu0 %v921_v9  ;;  %v901_v19 = vmax.f32 %v835_v12, 0.0 }
 0x1e9   : > { %v837_v15 = vpop.f32.mrf.mxu1  ;;  %1872 = vmatmul.mubr.bf16.gmra.mxu0 %v922_v10 }
 0x1ea   : > { %v838_v16 = vadd.f32 %v2184_v3, %v837_v15  ;;  %v904_v17 = vmax.f32 %v846_v13, 0.0 }
 0x1eb   : > { %v1833_v18 = vpop.f32.mrf.mxu1 }
 0x1ec   : > { %v902_v20 = vmax.f32 %v838_v16, 0.0  ;;  %v924_v24 = vpack.c.bf16 %v904_v17, %v903_v21  ;;  %v859_v28 = vadd.f32 %v1833_v18, %v2184_v3 }
 0x1ed   : > { %v850_v22 = vpop.f32.mrf.mxu1 }
 0x1ee   : > { %v923_v23 = vpack.c.bf16 %v902_v20, %v901_v19  ;;  %v851_v26 = vadd.f32 %v2184_v3, %v850_v22  ;;  %v907_v35 = vmax.f32 %v859_v28, 0.0 }
 0x1ef   : > { %v1834_v25 = vpop.f32.mrf.mxu1 }
 0x1f0   : > { %v862_v27 = vadd.f32 %v1834_v25, %v2184_v3  ;;  %1875 = vmatprep.mubr.bf16.mxu0 %v923_v23  ;;  %v905_v33 = vmax.f32 %v851_v26, 0.0 }
 0x1f1   : > { %v853_v29 = vpop.f32.mrf.mxu1  ;;  %1876 = vmatmul.mubr.bf16.gmra.mxu0 %v924_v24 }
 0x1f2   : > { %v854_v30 = vadd.f32 %v2184_v3, %v853_v29  ;;  %v908_v31 = vmax.f32 %v862_v27, 0.0 }
 0x1f3   : > { %v1837_v32 = vpop.f32.mrf.mxu1 }
 0x1f4   : > { %v906_v34 = vmax.f32 %v854_v30, 0.0  ;;  %v926_v38 = vpack.c.bf16 %v908_v31, %v907_v35  ;;  %v875_v43 = vadd.f32 %v1837_v32, %v2184_v3 }
 0x1f5   : > { %v866_v36 = vpop.f32.mrf.mxu1 }
 0x1f6   : > { %v925_v37 = vpack.c.bf16 %v906_v34, %v905_v33  ;;  %v867_v41 = vadd.f32 %v2184_v3, %v866_v36  ;;  %v911_v49 = vmax.f32 %v875_v43, 0.0 }
 0x1f7   : > { %v1838_v39 = vpop.f32.mrf.mxu1 }
 0x1f8   : > { %v878_v42 = vadd.f32 %v1838_v39, %v2184_v3  ;;  %1879 = vmatprep.mubr.bf16.mxu0 %v925_v37  ;;  %v909_v47 = vmax.f32 %v867_v41, 0.0 }
 0x1f9   : > { %v869_v44 = vpop.f32.mrf.mxu1  ;;  %1880 = vmatmul.mubr.bf16.gmra.mxu0 %v926_v38 }
 0x1fa   : > { %v870_v45 = vadd.f32 %v2184_v3, %v869_v44  ;;  %v912_v46 = vmax.f32 %v878_v42, 0.0  ;;  %v2224_v3 = vld [vmem:[%s2338_s2 + $0x2] ss:$0 sm:$0xff] }
 0x1fc   : > { %v910_v48 = vmax.f32 %v870_v45, 0.0  ;;  %v928_v51 = vpack.c.bf16 %v912_v46, %v911_v49 }
 0x1fe   : > { %v927_v50 = vpack.c.bf16 %v910_v48, %v909_v47 }
 0x200   : > { %1883 = vmatprep.mubr.bf16.mxu0 %v927_v50 }
 0x201   : > { %1884 = vmatmul.mubr.bf16.gmra.mxu0 %v928_v51 }
 0x289   : > { %v1857_v53 = vpop.f32.mrf.mxu0 }
 0x28a   : > { %v1045_v58 = vadd.f32 %v1857_v53, %v2224_v3 }
 0x28b   : > { %v1036_v54 = vpop.f32.mrf.mxu0 }
 0x28c   : > { %v1037_v56 = vadd.f32 %v2224_v3, %v1036_v54  ;;  %v1165_v0 = vmax.f32 %v1045_v58, 0.0 }
 0x28d   : > { %v1858_v55 = vpop.f32.mrf.mxu0 }
 0x28e   : > { %v1048_v57 = vadd.f32 %v1858_v55, %v2224_v3  ;;  %v1163_v62 = vmax.f32 %v1037_v56, 0.0 }
 0x28f   : > { %v1039_v40 = vpop.f32.mrf.mxu0 }
 0x290   : > { %v1040_v59 = vadd.f32 %v2224_v3, %v1039_v40  ;;  %v1166_v60 = vmax.f32 %v1048_v57, 0.0 }
 0x291   : > { %v1861_v61 = vpop.f32.mrf.mxu0 }
 0x292   : > { %v1164_v63 = vmax.f32 %v1040_v59, 0.0  ;;  %v1196_v4 = vpack.c.bf16 %v1166_v60, %v1165_v0  ;;  %v1061_v8 = vadd.f32 %v1861_v61, %v2224_v3 }
 0x293   : > { %v1052_v1 = vpop.f32.mrf.mxu0 }
 0x294   : > { %v1195_v2 = vpack.c.bf16 %v1164_v63, %v1163_v62  ;;  %v1053_v6 = vadd.f32 %v2224_v3, %v1052_v1  ;;  %v1169_v15 = vmax.f32 %v1061_v8, 0.0 }
 0x295   : > { %v1862_v5 = vpop.f32.mrf.mxu0 }
 0x296   : > { %v1064_v7 = vadd.f32 %v1862_v5, %v2224_v3  ;;  %1903 = vmatprep.mubr.bf16.mxu1 %v1195_v2  ;;  %v1167_v13 = vmax.f32 %v1053_v6, 0.0 }
 0x297   : > { %v1055_v9 = vpop.f32.mrf.mxu0  ;;  %1904 = vmatmul.mubr.bf16.vlgmr.msra.gmra.mxu1 %v1196_v4 }
 0x298   : > { %v1056_v10 = vadd.f32 %v2224_v3, %v1055_v9  ;;  %v1170_v11 = vmax.f32 %v1064_v7, 0.0 }
 0x299   : > { %v1865_v12 = vpop.f32.mrf.mxu0 }
 0x29a   : > { %v1168_v14 = vmax.f32 %v1056_v10, 0.0  ;;  %v1198_v18 = vpack.c.bf16 %v1170_v11, %v1169_v15  ;;  %v1077_v22 = vadd.f32 %v1865_v12, %v2224_v3 }
 0x29b   : > { %v1068_v16 = vpop.f32.mrf.mxu0 }
 0x29c   : > { %v1197_v17 = vpack.c.bf16 %v1168_v14, %v1167_v13  ;;  %v1069_v20 = vadd.f32 %v2224_v3, %v1068_v16  ;;  %v1173_v29 = vmax.f32 %v1077_v22, 0.0 }
 0x29d   : > { %v1866_v19 = vpop.f32.mrf.mxu0 }
 0x29e   : > { %v1080_v21 = vadd.f32 %v1866_v19, %v2224_v3  ;;  %1907 = vmatprep.mubr.bf16.mxu1 %v1197_v17  ;;  %v1171_v27 = vmax.f32 %v1069_v20, 0.0 }
 0x29f   : > { %v1071_v23 = vpop.f32.mrf.mxu0  ;;  %1908 = vmatmul.mubr.bf16.gmra.mxu1 %v1198_v18 }
 0x2a0   : > { %v1072_v24 = vadd.f32 %v2224_v3, %v1071_v23  ;;  %v1174_v25 = vmax.f32 %v1080_v21, 0.0 }
 0x2a1   : > { %v1869_v26 = vpop.f32.mrf.mxu0 }
 0x2a2   : > { %v1172_v28 = vmax.f32 %v1072_v24, 0.0  ;;  %v1200_v32 = vpack.c.bf16 %v1174_v25, %v1173_v29  ;;  %v1093_v36 = vadd.f32 %v1869_v26, %v2224_v3 }
 0x2a3   : > { %v1084_v30 = vpop.f32.mrf.mxu0 }
 0x2a4   : > { %v1199_v31 = vpack.c.bf16 %v1172_v28, %v1171_v27  ;;  %v1085_v34 = vadd.f32 %v2224_v3, %v1084_v30  ;;  %v1177_v44 = vmax.f32 %v1093_v36, 0.0 }
 0x2a5   : > { %v1870_v33 = vpop.f32.mrf.mxu0 }
 0x2a6   : > { %v1096_v35 = vadd.f32 %v1870_v33, %v2224_v3  ;;  %1911 = vmatprep.mubr.bf16.mxu1 %v1199_v31  ;;  %v1175_v42 = vmax.f32 %v1085_v34, 0.0 }
 0x2a7   : > { %v1087_v37 = vpop.f32.mrf.mxu0  ;;  %1912 = vmatmul.mubr.bf16.gmra.mxu1 %v1200_v32 }
 0x2a8   : > { %v1088_v38 = vadd.f32 %v2224_v3, %v1087_v37  ;;  %v1178_v39 = vmax.f32 %v1096_v35, 0.0 }
 0x2a9   : > { %v1873_v41 = vpop.f32.mrf.mxu0 }
 0x2aa   : > { %v1176_v43 = vmax.f32 %v1088_v38, 0.0  ;;  %v1202_v47 = vpack.c.bf16 %v1178_v39, %v1177_v44  ;;  %v1109_v51 = vadd.f32 %v1873_v41, %v2224_v3  ;;  %v2262_v38 = vld [vmem:[%s2338_s2 + $0x3] ss:$0 sm:$0xff] }
 0x2ab   : > { %v1100_v45 = vpop.f32.mrf.mxu0 }
 0x2ac   : > { %v1201_v46 = vpack.c.bf16 %v1176_v43, %v1175_v42  ;;  %v1101_v49 = vadd.f32 %v2224_v3, %v1100_v45  ;;  %v1181_v58 = vmax.f32 %v1109_v51, 0.0 }
 0x2ad   : > { %v1874_v48 = vpop.f32.mrf.mxu0 }
 0x2ae   : > { %v1112_v50 = vadd.f32 %v1874_v48, %v2224_v3  ;;  %1915 = vmatprep.mubr.bf16.mxu1 %v1201_v46  ;;  %v1179_v56 = vmax.f32 %v1101_v49, 0.0 }
 0x2af   : > { %v1103_v52 = vpop.f32.mrf.mxu0  ;;  %1916 = vmatmul.mubr.bf16.gmra.mxu1 %v1202_v47 }
 0x2b0   : > { %v1104_v53 = vadd.f32 %v2224_v3, %v1103_v52  ;;  %v1182_v54 = vmax.f32 %v1112_v50, 0.0 }
 0x2b1   : > { %v1877_v55 = vpop.f32.mrf.mxu0 }
 0x2b2   : > { %v1180_v57 = vmax.f32 %v1104_v53, 0.0  ;;  %v1204_v60 = vpack.c.bf16 %v1182_v54, %v1181_v58  ;;  %v1125_v0 = vadd.f32 %v1877_v55, %v2224_v3 }
 0x2b3   : > { %v1116_v40 = vpop.f32.mrf.mxu0 }
 0x2b4   : > { %v1203_v59 = vpack.c.bf16 %v1180_v57, %v1179_v56  ;;  %v1117_v62 = vadd.f32 %v2224_v3, %v1116_v40  ;;  %v1185_v8 = vmax.f32 %v1125_v0, 0.0 }
 0x2b5   : > { %v1878_v61 = vpop.f32.mrf.mxu0 }
 0x2b6   : > { %v1128_v63 = vadd.f32 %v1878_v61, %v2224_v3  ;;  %1919 = vmatprep.mubr.bf16.mxu1 %v1203_v59  ;;  %v1183_v6 = vmax.f32 %v1117_v62, 0.0 }
 0x2b7   : > { %v1119_v1 = vpop.f32.mrf.mxu0  ;;  %1920 = vmatmul.mubr.bf16.gmra.mxu1 %v1204_v60 }
 0x2b8   : > { %v1120_v2 = vadd.f32 %v2224_v3, %v1119_v1  ;;  %v1186_v4 = vmax.f32 %v1128_v63, 0.0 }
 0x2b9   : > { %v1881_v5 = vpop.f32.mrf.mxu0 }
 0x2ba   : > { %v1184_v7 = vmax.f32 %v1120_v2, 0.0  ;;  %v1206_v11 = vpack.c.bf16 %v1186_v4, %v1185_v8  ;;  %v1141_v15 = vadd.f32 %v1881_v5, %v2224_v3 }
 0x2bb   : > { %v1132_v9 = vpop.f32.mrf.mxu0 }
 0x2bc   : > { %v1205_v10 = vpack.c.bf16 %v1184_v7, %v1183_v6  ;;  %v1133_v13 = vadd.f32 %v2224_v3, %v1132_v9  ;;  %v1189_v22 = vmax.f32 %v1141_v15, 0.0 }
 0x2bd   : > { %v1882_v12 = vpop.f32.mrf.mxu0 }
 0x2be   : > { %v1144_v14 = vadd.f32 %v1882_v12, %v2224_v3  ;;  %1923 = vmatprep.mubr.bf16.mxu1 %v1205_v10  ;;  %v1187_v20 = vmax.f32 %v1133_v13, 0.0 }
 0x2bf   : > { %v1135_v16 = vpop.f32.mrf.mxu0  ;;  %1924 = vmatmul.mubr.bf16.gmra.mxu1 %v1206_v11 }
 0x2c0   : > { %v1136_v17 = vadd.f32 %v2224_v3, %v1135_v16  ;;  %v1190_v18 = vmax.f32 %v1144_v14, 0.0 }
 0x2c1   : > { %v1885_v19 = vpop.f32.mrf.mxu0 }
 0x2c2   : > { %v1188_v21 = vmax.f32 %v1136_v17, 0.0  ;;  %v1208_v25 = vpack.c.bf16 %v1190_v18, %v1189_v22  ;;  %v1157_v29 = vadd.f32 %v1885_v19, %v2224_v3 }
 0x2c3   : > { %v1148_v23 = vpop.f32.mrf.mxu0 }
 0x2c4   : > { %v1207_v24 = vpack.c.bf16 %v1188_v21, %v1187_v20  ;;  %v1149_v27 = vadd.f32 %v2224_v3, %v1148_v23  ;;  %v1193_v35 = vmax.f32 %v1157_v29, 0.0 }
 0x2c5   : > { %v1886_v26 = vpop.f32.mrf.mxu0 }
 0x2c6   : > { %v1160_v28 = vadd.f32 %v1886_v26, %v2224_v3  ;;  %1927 = vmatprep.mubr.bf16.mxu1 %v1207_v24  ;;  %v1191_v33 = vmax.f32 %v1149_v27, 0.0 }
 0x2c7   : > { %v1151_v30 = vpop.f32.mrf.mxu0  ;;  %1928 = vmatmul.mubr.bf16.gmra.mxu1 %v1208_v25 }
 0x2c8   : > { %v1152_v31 = vadd.f32 %v2224_v3, %v1151_v30  ;;  %v1194_v32 = vmax.f32 %v1160_v28, 0.0 }
 0x2ca   : > { %v1192_v34 = vmax.f32 %v1152_v31, 0.0  ;;  %v1210_v37 = vpack.c.bf16 %v1194_v32, %v1193_v35 }
 0x2cc   : > { %v1209_v36 = vpack.c.bf16 %v1192_v34, %v1191_v33 }
 0x2ce   : > { %1931 = vmatprep.mubr.bf16.mxu1 %v1209_v36 }
 0x2cf   : > { %1932 = vmatmul.mubr.bf16.gmra.mxu1 %v1210_v37 }
 0x357   : > { %v1905_v3 = vpop.f32.mrf.mxu1 }
 0x358   : > { %v1327_v39 = vadd.f32 %v1905_v3, %v2262_v38 }
 0x359   : > { %v1318_v41 = vpop.f32.mrf.mxu1 }
 0x35a   : > { %1447 = vst [vmem:[%s2267_s19 + $0x10] sm:$0xff] %v1327_v39  ;;  %v1319_v42 = vadd.f32 %v2262_v38, %v1318_v41 }
 0x35b   : > { %v1906_v43 = vpop.f32.mrf.mxu1 }
 0x35c   : > { %1445 = vst [vmem:[%s2267_s19] sm:$0xff] %v1319_v42  ;;  %v1330_v44 = vadd.f32 %v1906_v43, %v2262_v38 }
 0x35d   : > { %v1321_v45 = vpop.f32.mrf.mxu1 }
 0x35e   : > { %1448 = vst [vmem:[%s2267_s19 + $0x18] sm:$0xff] %v1330_v44  ;;  %v1322_v46 = vadd.f32 %v2262_v38, %v1321_v45 }
 0x35f   : > { %v1909_v47 = vpop.f32.mrf.mxu1 }
 0x360   : > { %1446 = vst [vmem:[%s2267_s19 + $0x8] sm:$0xff] %v1322_v46  ;;  %v1343_v48 = vadd.f32 %v1909_v47, %v2262_v38 }
 0x361   : > { %v1334_v49 = vpop.f32.mrf.mxu1 }
 0x362   : > { %1451 = vst [vmem:[%s2267_s19 + $0x30] sm:$0xff] %v1343_v48  ;;  %v1335_v50 = vadd.f32 %v2262_v38, %v1334_v49 }
 0x363   : > { %v1910_v51 = vpop.f32.mrf.mxu1 }
 0x364   : > { %1449 = vst [vmem:[%s2267_s19 + $0x20] sm:$0xff] %v1335_v50  ;;  %v1346_v52 = vadd.f32 %v1910_v51, %v2262_v38 }
 0x365   : > { %v1337_v53 = vpop.f32.mrf.mxu1 }
 0x366   : > { %1452 = vst [vmem:[%s2267_s19 + $0x38] sm:$0xff] %v1346_v52  ;;  %v1338_v54 = vadd.f32 %v2262_v38, %v1337_v53 }
 0x367   : > { %v1913_v55 = vpop.f32.mrf.mxu1 }
 0x368   : > { %1450 = vst [vmem:[%s2267_s19 + $0x28] sm:$0xff] %v1338_v54  ;;  %v1359_v56 = vadd.f32 %v1913_v55, %v2262_v38 }
 0x369   : > { %v1350_v57 = vpop.f32.mrf.mxu1 }
 0x36a   : > { %1455 = vst [vmem:[%s2267_s19 + $0x50] sm:$0xff] %v1359_v56  ;;  %v1351_v58 = vadd.f32 %v2262_v38, %v1350_v57 }
 0x36b   : > { %v1914_v40 = vpop.f32.mrf.mxu1 }
 0x36c   : > { %1453 = vst [vmem:[%s2267_s19 + $0x40] sm:$0xff] %v1351_v58  ;;  %v1362_v59 = vadd.f32 %v1914_v40, %v2262_v38 }
 0x36d   : > { %v1353_v60 = vpop.f32.mrf.mxu1 }
 0x36e   : > { %1456 = vst [vmem:[%s2267_s19 + $0x58] sm:$0xff] %v1362_v59  ;;  %v1354_v61 = vadd.f32 %v2262_v38, %v1353_v60 }
 0x36f   : > { %v1917_v62 = vpop.f32.mrf.mxu1 }
 0x370   : > { %1454 = vst [vmem:[%s2267_s19 + $0x48] sm:$0xff] %v1354_v61  ;;  %v1375_v63 = vadd.f32 %v1917_v62, %v2262_v38 }
 0x371   : > { %v1366_v0 = vpop.f32.mrf.mxu1 }
 0x372   : > { %1459 = vst [vmem:[%s2267_s19 + $0x70] sm:$0xff] %v1375_v63  ;;  %v1367_v1 = vadd.f32 %v2262_v38, %v1366_v0 }
 0x373   : > { %v1918_v2 = vpop.f32.mrf.mxu1 }
 0x374   : > { %1457 = vst [vmem:[%s2267_s19 + $0x60] sm:$0xff] %v1367_v1  ;;  %v1378_v4 = vadd.f32 %v1918_v2, %v2262_v38 }
 0x375   : > { %v1369_v5 = vpop.f32.mrf.mxu1 }
 0x376   : > { %1460 = vst [vmem:[%s2267_s19 + $0x78] sm:$0xff] %v1378_v4  ;;  %v1370_v6 = vadd.f32 %v2262_v38, %v1369_v5 }
 0x377   : > { %v1921_v7 = vpop.f32.mrf.mxu1 }
 0x378   : > { %1458 = vst [vmem:[%s2267_s19 + $0x68] sm:$0xff] %v1370_v6  ;;  %v1391_v8 = vadd.f32 %v1921_v7, %v2262_v38 }
 0x379   : > { %v1382_v9 = vpop.f32.mrf.mxu1 }
 0x37a   : > { %1463 = vst [vmem:[%s2267_s19 + $0x90] sm:$0xff] %v1391_v8  ;;  %v1383_v10 = vadd.f32 %v2262_v38, %v1382_v9 }
 0x37b   : > { %v1922_v11 = vpop.f32.mrf.mxu1 }
 0x37c   : > { %1461 = vst [vmem:[%s2267_s19 + $0x80] sm:$0xff] %v1383_v10  ;;  %v1394_v12 = vadd.f32 %v1922_v11, %v2262_v38 }
 0x37d   : > { %v1385_v13 = vpop.f32.mrf.mxu1 }
 0x37e   : > { %1464 = vst [vmem:[%s2267_s19 + $0x98] sm:$0xff] %v1394_v12  ;;  %v1386_v14 = vadd.f32 %v2262_v38, %v1385_v13 }
 0x37f   : > { %v1925_v15 = vpop.f32.mrf.mxu1 }
 0x380   : > { %1462 = vst [vmem:[%s2267_s19 + $0x88] sm:$0xff] %v1386_v14  ;;  %v1407_v16 = vadd.f32 %v1925_v15, %v2262_v38 }
 0x381   : > { %v1398_v17 = vpop.f32.mrf.mxu1 }
 0x382   : > { %1467 = vst [vmem:[%s2267_s19 + $0xb0] sm:$0xff] %v1407_v16  ;;  %v1399_v18 = vadd.f32 %v2262_v38, %v1398_v17 }
 0x383   : > { %v1926_v19 = vpop.f32.mrf.mxu1 }
 0x384   : > { %1465 = vst [vmem:[%s2267_s19 + $0xa0] sm:$0xff] %v1399_v18  ;;  %v1410_v20 = vadd.f32 %v1926_v19, %v2262_v38 }
 0x385   : > { %v1401_v21 = vpop.f32.mrf.mxu1 }
 0x386   : > { %1468 = vst [vmem:[%s2267_s19 + $0xb8] sm:$0xff] %v1410_v20  ;;  %v1402_v22 = vadd.f32 %v2262_v38, %v1401_v21 }
 0x387   : > { %v1929_v23 = vpop.f32.mrf.mxu1 }
 0x388   : > { %1466 = vst [vmem:[%s2267_s19 + $0xa8] sm:$0xff] %v1402_v22  ;;  %v1423_v24 = vadd.f32 %v1929_v23, %v2262_v38 }
 0x389   : > { %v1414_v25 = vpop.f32.mrf.mxu1 }
 0x38a   : > { %1471 = vst [vmem:[%s2267_s19 + $0xd0] sm:$0xff] %v1423_v24  ;;  %v1415_v26 = vadd.f32 %v2262_v38, %v1414_v25 }
 0x38b   : > { %v1930_v27 = vpop.f32.mrf.mxu1 }
 0x38c   : > { %1469 = vst [vmem:[%s2267_s19 + $0xc0] sm:$0xff] %v1415_v26  ;;  %v1426_v28 = vadd.f32 %v1930_v27, %v2262_v38 }
 0x38d   : > { %v1417_v29 = vpop.f32.mrf.mxu1 }
 0x38e   : > { %1472 = vst [vmem:[%s2267_s19 + $0xd8] sm:$0xff] %v1426_v28  ;;  %v1418_v30 = vadd.f32 %v2262_v38, %v1417_v29 }
 0x38f   : > { %v1933_v31 = vpop.f32.mrf.mxu1 }
 0x390   : > { %1470 = vst [vmem:[%s2267_s19 + $0xc8] sm:$0xff] %v1418_v30  ;;  %v1439_v32 = vadd.f32 %v1933_v31, %v2262_v38 }
 0x391   : > { %v1430_v33 = vpop.f32.mrf.mxu1 }
 0x392   : > { %1475 = vst [vmem:[%s2267_s19 + $0xf0] sm:$0xff] %v1439_v32  ;;  %v1431_v34 = vadd.f32 %v2262_v38, %v1430_v33 }
 0x393   : > { %v1934_v35 = vpop.f32.mrf.mxu1 }
 0x394   : > { %1473 = vst [vmem:[%s2267_s19 + $0xe0] sm:$0xff] %v1431_v34  ;;  %v1442_v36 = vadd.f32 %v1934_v35, %v2262_v38 }
 0x395   : > { %v1433_v37 = vpop.f32.mrf.mxu1 }
 0x396   : > { %1476 = vst [vmem:[%s2267_s19 + $0xf8] sm:$0xff] %v1442_v36  ;;  %v1434_v3 = vadd.f32 %v2262_v38, %v1433_v37 }
 0x398   : > { %1474 = vst [vmem:[%s2267_s19 + $0xe8] sm:$0xff] %v1434_v3 }
 0x399 PF: > { %s13_s12 = sadd.s32 1, %s1997_s12  }
 0x39a   : > { %p10_p4 = scmp.ge.s32.totalorder %s13_s12, 4  }
 0x39c   :  { %12 = sbr.rel (!%p10_p4) target bundleno = 1 (0x1), region = 68 }

</bundles_post_ra>
